<compile_context>
chip_gen: v6e
topology: v6e:2x2x1
jax: 0.10.0
libtpu: 0.0.40
codegen_flags: <defaults>
</compile_context>

<pallas_src>
import jax
import jax.numpy as jnp
import numpy as np
from jax.experimental import pallas as pl
from jax.experimental.pallas import tpu as pltpu


def _round_up(x, m):
    return ((x + m - 1) // m) * m


def ngram_kernel(idx_ref, emb_ref, w1_ref, b1_ref, w2_ref, b2_ref, out_ref):
    """One vocab tile: in-register embedding gather -> linear1 + ReLU -> linear2 tile."""
    B, C = idx_ref.shape          # token ids in SMEM (scalar-prefetched)
    V, E = emb_ref.shape          # embedding table, VMEM-resident across the grid

    # --- Embedding gather, built entirely in registers (no VMEM scratch / stores):
    # C dynamic (1, E) row loads per batch element concatenated lane-wise, then the
    # B rows concatenated sublane-wise into the (B, C*E) activation value.
    rows = []
    for b in range(B):
        parts = []
        for c in range(C):
            tok = jnp.clip(idx_ref[b, c], 0, V - 1)   # guard OOB ids (no HW bounds check)
            parts.append(emb_ref[pl.ds(tok, 1), :])   # (1, E)
        rows.append(jnp.concatenate(parts, axis=1))   # (1, C*E)
    x = jnp.concatenate(rows, axis=0)                 # (B, C*E) f32

    # --- linear1 + ReLU against the pre-transposed (C*E, H) weight (MXU-native K, N).
    h = jnp.dot(x, w1_ref[...], preferred_element_type=jnp.float32) + b1_ref[...]
    h = jnp.maximum(h, 0.0)                           # (B, H) f32

    # --- linear2, this grid step's vocab tile: (B, H) @ (H, TILE_V), lane-dense store.
    out_ref[...] = (jnp.dot(h, w2_ref[...], preferred_element_type=jnp.float32)
                    + b2_ref[...])


def prepare_params(emb_table, w1, b1, w2, b2, max_tile_v=4096):
    """One-time parameter prep (model init, not per forward call): transpose weights to
    MXU-native (K, N) layouts and pad the vocab axis so every output tile is lane-dense."""
    V, _H = w2.shape
    tile_v = min(max_tile_v, _round_up(V, 128))
    v_pad = _round_up(V, tile_v)
    pad = v_pad - V
    return {
        # TODO(synk): at realistic V keep the table lane-dense (pack E toward 128 lanes)
        # or leave it in HBM (memory_space=pl.ANY) and gather rows with small async
        # copies instead of holding the whole (V, E) table in VMEM.
        "emb": emb_table.astype(jnp.float32),                                  # (V, E)
        "w1": jnp.transpose(w1).astype(jnp.float32),                           # (C*E, H)
        "b1": b1.reshape(1, -1).astype(jnp.float32),                           # (1, H)
        # TODO(synk): store w2 as bf16 (v5e/v6e) or fp8 + per-row scales (v7x) at
        # realistic vocab -- the w2 stream dominates HBM traffic there.
        "w2": jnp.pad(jnp.transpose(w2), ((0, 0), (0, pad))).astype(jnp.float32),  # (H, V_pad)
        "b2": jnp.pad(b2, ((0, pad),)).reshape(1, -1).astype(jnp.float32),     # (1, V_pad)
        "vocab": V,
        "vocab_pad": v_pad,
        "tile_v": tile_v,
    }


def ngram_forward(indices, params):
    """indices: (B, C) int; returns (B, V) float32 logits."""
    B, C = indices.shape
    V_emb, E = params["emb"].shape
    H = params["w1"].shape[1]
    v_pad = params["vocab_pad"]
    tile_v = params["tile_v"]

    logits_pad = pl.pallas_call(
        ngram_kernel,
        out_shape=jax.ShapeDtypeStruct((B, v_pad), jnp.float32),
        grid_spec=pltpu.PrefetchScalarGridSpec(
            num_scalar_prefetch=1,            # indices -> SMEM, first kernel arg
            grid=(v_pad // tile_v,),          # tile the vocab axis (w2 stream pipelined)
            in_specs=[
                pl.BlockSpec((V_emb, E), lambda j, idx: (0, 0)),     # emb (grid-invariant)
                pl.BlockSpec((C * E, H), lambda j, idx: (0, 0)),     # w1 (K, N)
                pl.BlockSpec((1, H), lambda j, idx: (0, 0)),         # b1
                pl.BlockSpec((H, tile_v), lambda j, idx: (0, j)),    # w2 vocab tile
                pl.BlockSpec((1, tile_v), lambda j, idx: (0, j)),    # b2 vocab tile
            ],
            out_specs=pl.BlockSpec((B, tile_v), lambda j, idx: (0, j)),
        ),
        compiler_params=pltpu.CompilerParams(
            # Vocab tiles are independent -> shard them across TensorCores.
            dimension_semantics=("parallel",),
            # TODO(synk): set vmem_limit_bytes explicitly when sizing tile_v for v7x's
            # 64 MiB VMEM (32 MiB scoped default) at realistic vocab sizes.
        ),
    )(indices.astype(jnp.int32), params["emb"], params["w1"], params["b1"],
      params["w2"], params["b2"])

    return logits_pad[:, :params["vocab"]]


def ngram_reference(indices, emb_table, w1, b1, w2, b2):
    embeds = emb_table[indices]                       # (B, C, E)
    x = embeds.reshape(embeds.shape[0], -1)           # (B, C*E)
    h = jnp.maximum(x @ w1.T + b1, 0.0)
    return h @ w2.T + b2


if __name__ == "__main__":
    # Small deterministic shapes consistent with the module (linear1 hidden = 128).
    VOCAB = 64
    EMBED = 16
    CONTEXT = 4
    HIDDEN = 128
    BATCH = 8

    key = jax.random.PRNGKey(0)
    k_idx, k_emb, k_w1, k_b1, k_w2, k_b2 = jax.random.split(key, 6)

    indices = jax.random.randint(k_idx, (BATCH, CONTEXT), 0, VOCAB, dtype=jnp.int32)
    emb_table = jax.random.normal(k_emb, (VOCAB, EMBED), dtype=jnp.float32) * 0.1
    w1 = jax.random.normal(k_w1, (HIDDEN, CONTEXT * EMBED), dtype=jnp.float32) * 0.1
    b1 = jax.random.normal(k_b1, (HIDDEN,), dtype=jnp.float32) * 0.1
    w2 = jax.random.normal(k_w2, (VOCAB, HIDDEN), dtype=jnp.float32) * 0.1
    b2 = jax.random.normal(k_b2, (VOCAB,), dtype=jnp.float32) * 0.1

    params = prepare_params(emb_table, w1, b1, w2, b2)
    logits = ngram_forward(indices, params)
    logits = jax.block_until_ready(logits)

    ref = ngram_reference(indices, emb_table, w1, b1, w2, b2)
    # f32 everywhere; small tolerance for MXU multi-pass f32 vs XLA default matmul.
    np.testing.assert_allclose(np.asarray(logits), np.asarray(ref), rtol=1e-2, atol=1e-2)

    print("KERNEL_OK")
</pallas_src>

<mosaic_0001>
module attributes {stable_mosaic.version = 11 : i64} {
  func.func @ngram_kernel(%arg0: i32, %arg1: memref<8x4xi32, #tpu.memory_space<smem>>, %arg2: memref<64x16xf32, #tpu.memory_space<vmem>>, %arg3: memref<64x128xf32, #tpu.memory_space<vmem>>, %arg4: memref<1x128xf32, #tpu.memory_space<vmem>>, %arg5: memref<128x128xf32, #tpu.memory_space<vmem>>, %arg6: memref<1x128xf32, #tpu.memory_space<vmem>>, %arg7: memref<8x128xf32, #tpu.memory_space<vmem>>) attributes {dimension_semantics = [#tpu.dimension_semantics<parallel>], iteration_bounds = array<i64: 1>, scalar_prefetch = 1 : i64, scratch_operands = 0 : i64, tpu.core_type = #tpu.core_type<tc>, window_params = [{pipeline_mode = #tpu.pipeline_mode<synchronous>, transform_indices = @transform_0, window_bounds = array<i64: 64, 16>}, {pipeline_mode = #tpu.pipeline_mode<synchronous>, transform_indices = @transform_1, window_bounds = array<i64: 64, 128>}, {pipeline_mode = #tpu.pipeline_mode<synchronous>, transform_indices = @transform_2, window_bounds = array<i64: 1, 128>}, {transform_indices = @transform_3, window_bounds = array<i64: 128, 128>}, {transform_indices = @transform_4, window_bounds = array<i64: 1, 128>}, {transform_indices = @transform_5, window_bounds = array<i64: 8, 128>}]} {
    %c0 = arith.constant 0 : index
    %c0_0 = arith.constant 0 : index
    %0 = memref.load %arg1[%c0, %c0_0] : memref<8x4xi32, #tpu.memory_space<smem>>
    %c0_i32 = arith.constant 0 : i32
    %c63_i32 = arith.constant 63 : i32
    %1 = arith.maxsi %c0_i32, %0 : i32
    %2 = arith.minsi %c63_i32, %1 : i32
    %3 = arith.index_cast %2 : i32 to index
    %c0_1 = arith.constant 0 : index
    %4 = vector.load %arg2[%3, %c0_1] : memref<64x16xf32, #tpu.memory_space<vmem>>, vector<1x16xf32>
    %c0_2 = arith.constant 0 : index
    %c1 = arith.constant 1 : index
    %5 = memref.load %arg1[%c0_2, %c1] : memref<8x4xi32, #tpu.memory_space<smem>>
    %c0_i32_3 = arith.constant 0 : i32
    %c63_i32_4 = arith.constant 63 : i32
    %6 = arith.maxsi %c0_i32_3, %5 : i32
    %7 = arith.minsi %c63_i32_4, %6 : i32
    %8 = arith.index_cast %7 : i32 to index
    %c0_5 = arith.constant 0 : index
    %9 = vector.load %arg2[%8, %c0_5] : memref<64x16xf32, #tpu.memory_space<vmem>>, vector<1x16xf32>
    %c0_6 = arith.constant 0 : index
    %c2 = arith.constant 2 : index
    %10 = memref.load %arg1[%c0_6, %c2] : memref<8x4xi32, #tpu.memory_space<smem>>
    %c0_i32_7 = arith.constant 0 : i32
    %c63_i32_8 = arith.constant 63 : i32
    %11 = arith.maxsi %c0_i32_7, %10 : i32
    %12 = arith.minsi %c63_i32_8, %11 : i32
    %13 = arith.index_cast %12 : i32 to index
    %c0_9 = arith.constant 0 : index
    %14 = vector.load %arg2[%13, %c0_9] : memref<64x16xf32, #tpu.memory_space<vmem>>, vector<1x16xf32>
    %c0_10 = arith.constant 0 : index
    %c3 = arith.constant 3 : index
    %15 = memref.load %arg1[%c0_10, %c3] : memref<8x4xi32, #tpu.memory_space<smem>>
    %c0_i32_11 = arith.constant 0 : i32
    %c63_i32_12 = arith.constant 63 : i32
    %16 = arith.maxsi %c0_i32_11, %15 : i32
    %17 = arith.minsi %c63_i32_12, %16 : i32
    %18 = arith.index_cast %17 : i32 to index
    %c0_13 = arith.constant 0 : index
    %19 = vector.load %arg2[%18, %c0_13] : memref<64x16xf32, #tpu.memory_space<vmem>>, vector<1x16xf32>
    %20 = tpu.concatenate %4, %9, %14, %19 in 1 : vector<1x16xf32>, vector<1x16xf32>, vector<1x16xf32>, vector<1x16xf32> -> vector<1x64xf32>
    %c1_14 = arith.constant 1 : index
    %c0_15 = arith.constant 0 : index
    %21 = memref.load %arg1[%c1_14, %c0_15] : memref<8x4xi32, #tpu.memory_space<smem>>
    %c0_i32_16 = arith.constant 0 : i32
    %c63_i32_17 = arith.constant 63 : i32
    %22 = arith.maxsi %c0_i32_16, %21 : i32
    %23 = arith.minsi %c63_i32_17, %22 : i32
    %24 = arith.index_cast %23 : i32 to index
    %c0_18 = arith.constant 0 : index
    %25 = vector.load %arg2[%24, %c0_18] : memref<64x16xf32, #tpu.memory_space<vmem>>, vector<1x16xf32>
    %c1_19 = arith.constant 1 : index
    %c1_20 = arith.constant 1 : index
    %26 = memref.load %arg1[%c1_19, %c1_20] : memref<8x4xi32, #tpu.memory_space<smem>>
    %c0_i32_21 = arith.constant 0 : i32
    %c63_i32_22 = arith.constant 63 : i32
    %27 = arith.maxsi %c0_i32_21, %26 : i32
    %28 = arith.minsi %c63_i32_22, %27 : i32
    %29 = arith.index_cast %28 : i32 to index
    %c0_23 = arith.constant 0 : index
    %30 = vector.load %arg2[%29, %c0_23] : memref<64x16xf32, #tpu.memory_space<vmem>>, vector<1x16xf32>
    %c1_24 = arith.constant 1 : index
    %c2_25 = arith.constant 2 : index
    %31 = memref.load %arg1[%c1_24, %c2_25] : memref<8x4xi32, #tpu.memory_space<smem>>
    %c0_i32_26 = arith.constant 0 : i32
    %c63_i32_27 = arith.constant 63 : i32
    %32 = arith.maxsi %c0_i32_26, %31 : i32
    %33 = arith.minsi %c63_i32_27, %32 : i32
    %34 = arith.index_cast %33 : i32 to index
    %c0_28 = arith.constant 0 : index
    %35 = vector.load %arg2[%34, %c0_28] : memref<64x16xf32, #tpu.memory_space<vmem>>, vector<1x16xf32>
    %c1_29 = arith.constant 1 : index
    %c3_30 = arith.constant 3 : index
    %36 = memref.load %arg1[%c1_29, %c3_30] : memref<8x4xi32, #tpu.memory_space<smem>>
    %c0_i32_31 = arith.constant 0 : i32
    %c63_i32_32 = arith.constant 63 : i32
    %37 = arith.maxsi %c0_i32_31, %36 : i32
    %38 = arith.minsi %c63_i32_32, %37 : i32
    %39 = arith.index_cast %38 : i32 to index
    %c0_33 = arith.constant 0 : index
    %40 = vector.load %arg2[%39, %c0_33] : memref<64x16xf32, #tpu.memory_space<vmem>>, vector<1x16xf32>
    %41 = tpu.concatenate %25, %30, %35, %40 in 1 : vector<1x16xf32>, vector<1x16xf32>, vector<1x16xf32>, vector<1x16xf32> -> vector<1x64xf32>
    %c2_34 = arith.constant 2 : index
    %c0_35 = arith.constant 0 : index
    %42 = memref.load %arg1[%c2_34, %c0_35] : memref<8x4xi32, #tpu.memory_space<smem>>
    %c0_i32_36 = arith.constant 0 : i32
    %c63_i32_37 = arith.constant 63 : i32
    %43 = arith.maxsi %c0_i32_36, %42 : i32
    %44 = arith.minsi %c63_i32_37, %43 : i32
    %45 = arith.index_cast %44 : i32 to index
    %c0_38 = arith.constant 0 : index
    %46 = vector.load %arg2[%45, %c0_38] : memref<64x16xf32, #tpu.memory_space<vmem>>, vector<1x16xf32>
    %c2_39 = arith.constant 2 : index
    %c1_40 = arith.constant 1 : index
    %47 = memref.load %arg1[%c2_39, %c1_40] : memref<8x4xi32, #tpu.memory_space<smem>>
    %c0_i32_41 = arith.constant 0 : i32
    %c63_i32_42 = arith.constant 63 : i32
    %48 = arith.maxsi %c0_i32_41, %47 : i32
    %49 = arith.minsi %c63_i32_42, %48 : i32
    %50 = arith.index_cast %49 : i32 to index
    %c0_43 = arith.constant 0 : index
    %51 = vector.load %arg2[%50, %c0_43] : memref<64x16xf32, #tpu.memory_space<vmem>>, vector<1x16xf32>
    %c2_44 = arith.constant 2 : index
    %c2_45 = arith.constant 2 : index
    %52 = memref.load %arg1[%c2_44, %c2_45] : memref<8x4xi32, #tpu.memory_space<smem>>
    %c0_i32_46 = arith.constant 0 : i32
    %c63_i32_47 = arith.constant 63 : i32
    %53 = arith.maxsi %c0_i32_46, %52 : i32
    %54 = arith.minsi %c63_i32_47, %53 : i32
    %55 = arith.index_cast %54 : i32 to index
    %c0_48 = arith.constant 0 : index
    %56 = vector.load %arg2[%55, %c0_48] : memref<64x16xf32, #tpu.memory_space<vmem>>, vector<1x16xf32>
    %c2_49 = arith.constant 2 : index
    %c3_50 = arith.constant 3 : index
    %57 = memref.load %arg1[%c2_49, %c3_50] : memref<8x4xi32, #tpu.memory_space<smem>>
    %c0_i32_51 = arith.constant 0 : i32
    %c63_i32_52 = arith.constant 63 : i32
    %58 = arith.maxsi %c0_i32_51, %57 : i32
    %59 = arith.minsi %c63_i32_52, %58 : i32
    %60 = arith.index_cast %59 : i32 to index
    %c0_53 = arith.constant 0 : index
    %61 = vector.load %arg2[%60, %c0_53] : memref<64x16xf32, #tpu.memory_space<vmem>>, vector<1x16xf32>
    %62 = tpu.concatenate %46, %51, %56, %61 in 1 : vector<1x16xf32>, vector<1x16xf32>, vector<1x16xf32>, vector<1x16xf32> -> vector<1x64xf32>
    %c3_54 = arith.constant 3 : index
    %c0_55 = arith.constant 0 : index
    %63 = memref.load %arg1[%c3_54, %c0_55] : memref<8x4xi32, #tpu.memory_space<smem>>
    %c0_i32_56 = arith.constant 0 : i32
    %c63_i32_57 = arith.constant 63 : i32
    %64 = arith.maxsi %c0_i32_56, %63 : i32
    %65 = arith.minsi %c63_i32_57, %64 : i32
    %66 = arith.index_cast %65 : i32 to index
    %c0_58 = arith.constant 0 : index
    %67 = vector.load %arg2[%66, %c0_58] : memref<64x16xf32, #tpu.memory_space<vmem>>, vector<1x16xf32>
    %c3_59 = arith.constant 3 : index
    %c1_60 = arith.constant 1 : index
    %68 = memref.load %arg1[%c3_59, %c1_60] : memref<8x4xi32, #tpu.memory_space<smem>>
    %c0_i32_61 = arith.constant 0 : i32
    %c63_i32_62 = arith.constant 63 : i32
    %69 = arith.maxsi %c0_i32_61, %68 : i32
    %70 = arith.minsi %c63_i32_62, %69 : i32
    %71 = arith.index_cast %70 : i32 to index
    %c0_63 = arith.constant 0 : index
    %72 = vector.load %arg2[%71, %c0_63] : memref<64x16xf32, #tpu.memory_space<vmem>>, vector<1x16xf32>
    %c3_64 = arith.constant 3 : index
    %c2_65 = arith.constant 2 : index
    %73 = memref.load %arg1[%c3_64, %c2_65] : memref<8x4xi32, #tpu.memory_space<smem>>
    %c0_i32_66 = arith.constant 0 : i32
    %c63_i32_67 = arith.constant 63 : i32
    %74 = arith.maxsi %c0_i32_66, %73 : i32
    %75 = arith.minsi %c63_i32_67, %74 : i32
    %76 = arith.index_cast %75 : i32 to index
    %c0_68 = arith.constant 0 : index
    %77 = vector.load %arg2[%76, %c0_68] : memref<64x16xf32, #tpu.memory_space<vmem>>, vector<1x16xf32>
    %c3_69 = arith.constant 3 : index
    %c3_70 = arith.constant 3 : index
    %78 = memref.load %arg1[%c3_69, %c3_70] : memref<8x4xi32, #tpu.memory_space<smem>>
    %c0_i32_71 = arith.constant 0 : i32
    %c63_i32_72 = arith.constant 63 : i32
    %79 = arith.maxsi %c0_i32_71, %78 : i32
    %80 = arith.minsi %c63_i32_72, %79 : i32
    %81 = arith.index_cast %80 : i32 to index
    %c0_73 = arith.constant 0 : index
    %82 = vector.load %arg2[%81, %c0_73] : memref<64x16xf32, #tpu.memory_space<vmem>>, vector<1x16xf32>
    %83 = tpu.concatenate %67, %72, %77, %82 in 1 : vector<1x16xf32>, vector<1x16xf32>, vector<1x16xf32>, vector<1x16xf32> -> vector<1x64xf32>
    %c4 = arith.constant 4 : index
    %c0_74 = arith.constant 0 : index
    %84 = memref.load %arg1[%c4, %c0_74] : memref<8x4xi32, #tpu.memory_space<smem>>
    %c0_i32_75 = arith.constant 0 : i32
    %c63_i32_76 = arith.constant 63 : i32
    %85 = arith.maxsi %c0_i32_75, %84 : i32
    %86 = arith.minsi %c63_i32_76, %85 : i32
    %87 = arith.index_cast %86 : i32 to index
    %c0_77 = arith.constant 0 : index
    %88 = vector.load %arg2[%87, %c0_77] : memref<64x16xf32, #tpu.memory_space<vmem>>, vector<1x16xf32>
    %c4_78 = arith.constant 4 : index
    %c1_79 = arith.constant 1 : index
    %89 = memref.load %arg1[%c4_78, %c1_79] : memref<8x4xi32, #tpu.memory_space<smem>>
    %c0_i32_80 = arith.constant 0 : i32
    %c63_i32_81 = arith.constant 63 : i32
    %90 = arith.maxsi %c0_i32_80, %89 : i32
    %91 = arith.minsi %c63_i32_81, %90 : i32
    %92 = arith.index_cast %91 : i32 to index
    %c0_82 = arith.constant 0 : index
    %93 = vector.load %arg2[%92, %c0_82] : memref<64x16xf32, #tpu.memory_space<vmem>>, vector<1x16xf32>
    %c4_83 = arith.constant 4 : index
    %c2_84 = arith.constant 2 : index
    %94 = memref.load %arg1[%c4_83, %c2_84] : memref<8x4xi32, #tpu.memory_space<smem>>
    %c0_i32_85 = arith.constant 0 : i32
    %c63_i32_86 = arith.constant 63 : i32
    %95 = arith.maxsi %c0_i32_85, %94 : i32
    %96 = arith.minsi %c63_i32_86, %95 : i32
    %97 = arith.index_cast %96 : i32 to index
    %c0_87 = arith.constant 0 : index
    %98 = vector.load %arg2[%97, %c0_87] : memref<64x16xf32, #tpu.memory_space<vmem>>, vector<1x16xf32>
    %c4_88 = arith.constant 4 : index
    %c3_89 = arith.constant 3 : index
    %99 = memref.load %arg1[%c4_88, %c3_89] : memref<8x4xi32, #tpu.memory_space<smem>>
    %c0_i32_90 = arith.constant 0 : i32
    %c63_i32_91 = arith.constant 63 : i32
    %100 = arith.maxsi %c0_i32_90, %99 : i32
    %101 = arith.minsi %c63_i32_91, %100 : i32
    %102 = arith.index_cast %101 : i32 to index
    %c0_92 = arith.constant 0 : index
    %103 = vector.load %arg2[%102, %c0_92] : memref<64x16xf32, #tpu.memory_space<vmem>>, vector<1x16xf32>
    %104 = tpu.concatenate %88, %93, %98, %103 in 1 : vector<1x16xf32>, vector<1x16xf32>, vector<1x16xf32>, vector<1x16xf32> -> vector<1x64xf32>
    %c5 = arith.constant 5 : index
    %c0_93 = arith.constant 0 : index
    %105 = memref.load %arg1[%c5, %c0_93] : memref<8x4xi32, #tpu.memory_space<smem>>
    %c0_i32_94 = arith.constant 0 : i32
    %c63_i32_95 = arith.constant 63 : i32
    %106 = arith.maxsi %c0_i32_94, %105 : i32
    %107 = arith.minsi %c63_i32_95, %106 : i32
    %108 = arith.index_cast %107 : i32 to index
    %c0_96 = arith.constant 0 : index
    %109 = vector.load %arg2[%108, %c0_96] : memref<64x16xf32, #tpu.memory_space<vmem>>, vector<1x16xf32>
    %c5_97 = arith.constant 5 : index
    %c1_98 = arith.constant 1 : index
    %110 = memref.load %arg1[%c5_97, %c1_98] : memref<8x4xi32, #tpu.memory_space<smem>>
    %c0_i32_99 = arith.constant 0 : i32
    %c63_i32_100 = arith.constant 63 : i32
    %111 = arith.maxsi %c0_i32_99, %110 : i32
    %112 = arith.minsi %c63_i32_100, %111 : i32
    %113 = arith.index_cast %112 : i32 to index
    %c0_101 = arith.constant 0 : index
    %114 = vector.load %arg2[%113, %c0_101] : memref<64x16xf32, #tpu.memory_space<vmem>>, vector<1x16xf32>
    %c5_102 = arith.constant 5 : index
    %c2_103 = arith.constant 2 : index
    %115 = memref.load %arg1[%c5_102, %c2_103] : memref<8x4xi32, #tpu.memory_space<smem>>
    %c0_i32_104 = arith.constant 0 : i32
    %c63_i32_105 = arith.constant 63 : i32
    %116 = arith.maxsi %c0_i32_104, %115 : i32
    %117 = arith.minsi %c63_i32_105, %116 : i32
    %118 = arith.index_cast %117 : i32 to index
    %c0_106 = arith.constant 0 : index
    %119 = vector.load %arg2[%118, %c0_106] : memref<64x16xf32, #tpu.memory_space<vmem>>, vector<1x16xf32>
    %c5_107 = arith.constant 5 : index
    %c3_108 = arith.constant 3 : index
    %120 = memref.load %arg1[%c5_107, %c3_108] : memref<8x4xi32, #tpu.memory_space<smem>>
    %c0_i32_109 = arith.constant 0 : i32
    %c63_i32_110 = arith.constant 63 : i32
    %121 = arith.maxsi %c0_i32_109, %120 : i32
    %122 = arith.minsi %c63_i32_110, %121 : i32
    %123 = arith.index_cast %122 : i32 to index
    %c0_111 = arith.constant 0 : index
    %124 = vector.load %arg2[%123, %c0_111] : memref<64x16xf32, #tpu.memory_space<vmem>>, vector<1x16xf32>
    %125 = tpu.concatenate %109, %114, %119, %124 in 1 : vector<1x16xf32>, vector<1x16xf32>, vector<1x16xf32>, vector<1x16xf32> -> vector<1x64xf32>
    %c6 = arith.constant 6 : index
    %c0_112 = arith.constant 0 : index
    %126 = memref.load %arg1[%c6, %c0_112] : memref<8x4xi32, #tpu.memory_space<smem>>
    %c0_i32_113 = arith.constant 0 : i32
    %c63_i32_114 = arith.constant 63 : i32
    %127 = arith.maxsi %c0_i32_113, %126 : i32
    %128 = arith.minsi %c63_i32_114, %127 : i32
    %129 = arith.index_cast %128 : i32 to index
    %c0_115 = arith.constant 0 : index
    %130 = vector.load %arg2[%129, %c0_115] : memref<64x16xf32, #tpu.memory_space<vmem>>, vector<1x16xf32>
    %c6_116 = arith.constant 6 : index
    %c1_117 = arith.constant 1 : index
    %131 = memref.load %arg1[%c6_116, %c1_117] : memref<8x4xi32, #tpu.memory_space<smem>>
    %c0_i32_118 = arith.constant 0 : i32
    %c63_i32_119 = arith.constant 63 : i32
    %132 = arith.maxsi %c0_i32_118, %131 : i32
    %133 = arith.minsi %c63_i32_119, %132 : i32
    %134 = arith.index_cast %133 : i32 to index
    %c0_120 = arith.constant 0 : index
    %135 = vector.load %arg2[%134, %c0_120] : memref<64x16xf32, #tpu.memory_space<vmem>>, vector<1x16xf32>
    %c6_121 = arith.constant 6 : index
    %c2_122 = arith.constant 2 : index
    %136 = memref.load %arg1[%c6_121, %c2_122] : memref<8x4xi32, #tpu.memory_space<smem>>
    %c0_i32_123 = arith.constant 0 : i32
    %c63_i32_124 = arith.constant 63 : i32
    %137 = arith.maxsi %c0_i32_123, %136 : i32
    %138 = arith.minsi %c63_i32_124, %137 : i32
    %139 = arith.index_cast %138 : i32 to index
    %c0_125 = arith.constant 0 : index
    %140 = vector.load %arg2[%139, %c0_125] : memref<64x16xf32, #tpu.memory_space<vmem>>, vector<1x16xf32>
    %c6_126 = arith.constant 6 : index
    %c3_127 = arith.constant 3 : index
    %141 = memref.load %arg1[%c6_126, %c3_127] : memref<8x4xi32, #tpu.memory_space<smem>>
    %c0_i32_128 = arith.constant 0 : i32
    %c63_i32_129 = arith.constant 63 : i32
    %142 = arith.maxsi %c0_i32_128, %141 : i32
    %143 = arith.minsi %c63_i32_129, %142 : i32
    %144 = arith.index_cast %143 : i32 to index
    %c0_130 = arith.constant 0 : index
    %145 = vector.load %arg2[%144, %c0_130] : memref<64x16xf32, #tpu.memory_space<vmem>>, vector<1x16xf32>
    %146 = tpu.concatenate %130, %135, %140, %145 in 1 : vector<1x16xf32>, vector<1x16xf32>, vector<1x16xf32>, vector<1x16xf32> -> vector<1x64xf32>
    %c7 = arith.constant 7 : index
    %c0_131 = arith.constant 0 : index
    %147 = memref.load %arg1[%c7, %c0_131] : memref<8x4xi32, #tpu.memory_space<smem>>
    %c0_i32_132 = arith.constant 0 : i32
    %c63_i32_133 = arith.constant 63 : i32
    %148 = arith.maxsi %c0_i32_132, %147 : i32
    %149 = arith.minsi %c63_i32_133, %148 : i32
    %150 = arith.index_cast %149 : i32 to index
    %c0_134 = arith.constant 0 : index
    %151 = vector.load %arg2[%150, %c0_134] : memref<64x16xf32, #tpu.memory_space<vmem>>, vector<1x16xf32>
    %c7_135 = arith.constant 7 : index
    %c1_136 = arith.constant 1 : index
    %152 = memref.load %arg1[%c7_135, %c1_136] : memref<8x4xi32, #tpu.memory_space<smem>>
    %c0_i32_137 = arith.constant 0 : i32
    %c63_i32_138 = arith.constant 63 : i32
    %153 = arith.maxsi %c0_i32_137, %152 : i32
    %154 = arith.minsi %c63_i32_138, %153 : i32
    %155 = arith.index_cast %154 : i32 to index
    %c0_139 = arith.constant 0 : index
    %156 = vector.load %arg2[%155, %c0_139] : memref<64x16xf32, #tpu.memory_space<vmem>>, vector<1x16xf32>
    %c7_140 = arith.constant 7 : index
    %c2_141 = arith.constant 2 : index
    %157 = memref.load %arg1[%c7_140, %c2_141] : memref<8x4xi32, #tpu.memory_space<smem>>
    %c0_i32_142 = arith.constant 0 : i32
    %c63_i32_143 = arith.constant 63 : i32
    %158 = arith.maxsi %c0_i32_142, %157 : i32
    %159 = arith.minsi %c63_i32_143, %158 : i32
    %160 = arith.index_cast %159 : i32 to index
    %c0_144 = arith.constant 0 : index
    %161 = vector.load %arg2[%160, %c0_144] : memref<64x16xf32, #tpu.memory_space<vmem>>, vector<1x16xf32>
    %c7_145 = arith.constant 7 : index
    %c3_146 = arith.constant 3 : index
    %162 = memref.load %arg1[%c7_145, %c3_146] : memref<8x4xi32, #tpu.memory_space<smem>>
    %c0_i32_147 = arith.constant 0 : i32
    %c63_i32_148 = arith.constant 63 : i32
    %163 = arith.maxsi %c0_i32_147, %162 : i32
    %164 = arith.minsi %c63_i32_148, %163 : i32
    %165 = arith.index_cast %164 : i32 to index
    %c0_149 = arith.constant 0 : index
    %166 = vector.load %arg2[%165, %c0_149] : memref<64x16xf32, #tpu.memory_space<vmem>>, vector<1x16xf32>
    %167 = tpu.concatenate %151, %156, %161, %166 in 1 : vector<1x16xf32>, vector<1x16xf32>, vector<1x16xf32>, vector<1x16xf32> -> vector<1x64xf32>
    %168 = tpu.concatenate %20, %41, %62, %83, %104, %125, %146, %167 in 0 : vector<1x64xf32>, vector<1x64xf32>, vector<1x64xf32>, vector<1x64xf32>, vector<1x64xf32>, vector<1x64xf32>, vector<1x64xf32>, vector<1x64xf32> -> vector<8x64xf32>
    %c0_150 = arith.constant 0 : index
    %c0_151 = arith.constant 0 : index
    %169 = vector.load %arg3[%c0_150, %c0_151] : memref<64x128xf32, #tpu.memory_space<vmem>>, vector<64x128xf32>
    %cst = arith.constant dense<0.000000e+00> : vector<8x128xf32>
    %170 = tpu.matmul %168, %169, %cst {dimension_numbers = #tpu.dot_dimension_numbers<[1], [0], [0], [1], [0, 0, 1, 1], [], []>} : vector<8x64xf32>, vector<64x128xf32>, vector<8x128xf32> -> vector<8x128xf32>
    %c0_152 = arith.constant 0 : index
    %c0_153 = arith.constant 0 : index
    %171 = vector.load %arg4[%c0_152, %c0_153] : memref<1x128xf32, #tpu.memory_space<vmem>>, vector<1x128xf32>
    %172 = vector.broadcast %171 : vector<1x128xf32> to vector<8x128xf32>
    %173 = arith.addf %170, %172 : vector<8x128xf32>
    %cst_154 = arith.constant 0.000000e+00 : f32
    %174 = vector.broadcast %cst_154 : f32 to vector<8x128xf32>
    %175 = arith.maximumf %173, %174 : vector<8x128xf32>
    %c0_155 = arith.constant 0 : index
    %c0_156 = arith.constant 0 : index
    %176 = vector.load %arg5[%c0_155, %c0_156] : memref<128x128xf32, #tpu.memory_space<vmem>>, vector<128x128xf32>
    %cst_157 = arith.constant dense<0.000000e+00> : vector<8x128xf32>
    %177 = tpu.matmul %175, %176, %cst_157 {dimension_numbers = #tpu.dot_dimension_numbers<[1], [0], [0], [1], [0, 0, 1, 1], [], []>} : vector<8x128xf32>, vector<128x128xf32>, vector<8x128xf32> -> vector<8x128xf32>
    %c0_158 = arith.constant 0 : index
    %c0_159 = arith.constant 0 : index
    %178 = vector.load %arg6[%c0_158, %c0_159] : memref<1x128xf32, #tpu.memory_space<vmem>>, vector<1x128xf32>
    %179 = vector.broadcast %178 : vector<1x128xf32> to vector<8x128xf32>
    %180 = arith.addf %177, %179 : vector<8x128xf32>
    %c0_160 = arith.constant 0 : index
    %c0_161 = arith.constant 0 : index
    %181 = vector.load %arg7[%c0_160, %c0_161] : memref<8x128xf32, #tpu.memory_space<vmem>>, vector<8x128xf32>
    tpu.vector_store %arg7[%c0_160, %c0_161], %180 {strides = array<i32>} : memref<8x128xf32, #tpu.memory_space<vmem>>, vector<8x128xf32>,
    return
  }
  func.func @transform_0(%arg0: i32, %arg1: memref<8x4xi32, #tpu.memory_space<smem>>) -> (i32, i32) {
    %c0_i32 = arith.constant 0 : i32
    %c0_i32_0 = arith.constant 0 : i32
    %c0_i32_1 = arith.constant 0 : i32
    return %c0_i32, %c0_i32_0 : i32, i32
  }
  func.func @transform_1(%arg0: i32, %arg1: memref<8x4xi32, #tpu.memory_space<smem>>) -> (i32, i32) {
    %c0_i32 = arith.constant 0 : i32
    %c0_i32_0 = arith.constant 0 : i32
    %c0_i32_1 = arith.constant 0 : i32
    return %c0_i32, %c0_i32_0 : i32, i32
  }
  func.func @transform_2(%arg0: i32, %arg1: memref<8x4xi32, #tpu.memory_space<smem>>) -> (i32, i32) {
    %c0_i32 = arith.constant 0 : i32
    %c0_i32_0 = arith.constant 0 : i32
    %c0_i32_1 = arith.constant 0 : i32
    return %c0_i32, %c0_i32_0 : i32, i32
  }
  func.func @transform_3(%arg0: i32, %arg1: memref<8x4xi32, #tpu.memory_space<smem>>) -> (i32, i32) {
    %c0_i32 = arith.constant 0 : i32
    %c0_i32_0 = arith.constant 0 : i32
    return %c0_i32, %arg0 : i32, i32
  }
  func.func @transform_4(%arg0: i32, %arg1: memref<8x4xi32, #tpu.memory_space<smem>>) -> (i32, i32) {
    %c0_i32 = arith.constant 0 : i32
    %c0_i32_0 = arith.constant 0 : i32
    return %c0_i32, %arg0 : i32, i32
  }
  func.func @transform_5(%arg0: i32, %arg1: memref<8x4xi32, #tpu.memory_space<smem>>) -> (i32, i32) {
    %c0_i32 = arith.constant 0 : i32
    %c0_i32_0 = arith.constant 0 : i32
    return %c0_i32, %arg0 : i32, i32
  }
}

</mosaic_0001>

<bundles_post_ra>
// kernel: tpu_custom_call.1
= control target key start
LH: loop header
LB: loop body
LE: loop exit
PB: predicated region body
PF: predicated region fallthrough
CT: control target
= control target key end

     0   :  { %s1450_s0 = inlined_call_operand.vmem [shape: s32[8,4], index: 0, kind: input, shape index: {}]   ;;  %s1451_s1 = inlined_call_operand.vmem [shape: f32[64,16], index: 1, kind: input, shape index: {}]   ;;  %s1452_s2 = inlined_call_operand.vmem [shape: f32[64,128], index: 2, kind: input, shape index: {}]   ;;  %s1453_s3 = inlined_call_operand.vmem [shape: f32[1,128], index: 3, kind: input, shape index: {}]   ;;  %s1454_s4 = inlined_call_operand.hbm [shape: f32[128,128], index: 4, kind: input, shape index: {}]   ;;  %s1455_s5 = inlined_call_operand.vmem [shape: f32[1,128], index: 5, kind: input, shape index: {}]   ;;  %s1456_s6 = inlined_call_operand.hbm [shape: f32[8,128], index: 6, kind: output, shape index: {}]  }
   0x1   :  { %s11_s23 = sshll.u32 %s1450_s0, 4  ;;  %s12_s23 = int_to_ptr.vmem [resolvable:$true] %s11_s23 }
   0x2   :  { %s1003_s24 = scalar_lea.vmem %s12_s23, 128  ;;  %p1008_p1 = scmp.lt.s32.totalorder %s12_s23, %s12_s23 }
   0x3   :  { %p1004_p0 = scmp.ne.s32.totalorder %s12_s23, %s1003_s24  ;;  %p1009_p2 = scmp.lt.s32.totalorder %s1003_s24, %s1003_s24 }
   0x5   :  { %p1010_p3 = por %p1009_p2, %p1008_p1 }
   0x7   :  { %p1011_p4 = pnand %p1010_p3, %p1004_p0 }
   0x9   :  { %1014 = shalt.err (!%p1011_p4)  }
   0xa   :  { %s1061_s25 = smov [#allocation3]  }
   0xb   :  { %14 = dma.vmem_to_smem %s12_s23, 128, %s1061_s25, [#allocation2] }
   0xc   :  { %1055 = dma.done.wait [#allocation2], 128 }
   0xd   :  { %1056 = vsyncadd [#allocation2], 4294967168 }
   0xe   :  { %16 = sfence }
   0xf   :  { %17 = vsyncpa [#allocation5], 0 }
  0x10   :  { %18 = vsyncpa [#allocation6], 0  ;;  %s1062_s26 = smov [#allocation4]  }
  0x11   :  { %s30_s27 = sshll.u32 %s1062_s26, 4  ;;  %s31_s27 = int_to_ptr.vmem [resolvable:$true] %s30_s27 }
  0x12   :  { %s1023_s28 = scalar_lea.vmem %s31_s27, 2048  ;;  %p1028_p6 = scmp.lt.s32.totalorder %s31_s27, %s31_s27 }
  0x13   :  { %p1024_p5 = scmp.ne.s32.totalorder %s31_s27, %s1023_s28  ;;  %p1029_p7 = scmp.lt.s32.totalorder %s1023_s28, %s1023_s28 }
  0x15   :  { %p1030_p8 = por %p1029_p7, %p1028_p6 }
  0x17   :  { %p1031_p9 = pnand %p1030_p8, %p1024_p5 }
  0x19   :  { %1034 = shalt.err (!%p1031_p9)
}
  0x1a   :  { %s1063_s0 = smov 128   ;;  %s1064_s29 = smov 8  }
  0x1b   :  { %36 = dma.hbm_to_vmem [thread:$0]  %s1454_s4, 2048, %s31_s27, [#allocation5], %s1063_s0, %s1063_s0, %s1064_s29  }
  0x1c   :  { %1057 = dma.done.wait [#allocation5], 2048  }
  0x1d   :  { %1058 = vsyncadd [#allocation5], 4294965248  ;;  %s708_s8 = sld [smem:[#allocation3 + $0x101]]  ;;  %s1065_s19 = smov 16   ;;  %v431_v14 = vld [vmem:[%s1452_s2 + $0x38] sm:$0xff]  ;;  %v1068_v15 = vmov 0.0  }
  0x1e   :  { %s684_s9 = sld [smem:[#allocation3 + $0x81]]  ;;  %s1066_s23 = smov 32   ;;  %939 = vmatprep.subr.mxu0 %v1068_v15  ;;  %958 = vmatprep.subr.mxu1 %v1068_v15  ;;  %v430_v20 = vld [vmem:[%s1452_s2 + $0x30] sm:$0xff]  ;;  %v429_v21 = vld [vmem:[%s1452_s2 + $0x28] sm:$0xff]  ;;  %v428_v22 = vld [vmem:[%s1452_s2 + $0x20] sm:$0xff]  ;;  %vm1069_vm0 = vmmov 0  }
  0x1f   :  { %s690_s10 = sld [smem:[#allocation3 + $0x82]]  ;;  %s1067_s7 = smov 48   ;;  %940 = vmatpush3.msra.mxu0 %v431_v14  ;;  %v427_v23 = vld [vmem:[%s1452_s2 + $0x18] sm:$0xff]  ;;  %v426_v25 = vld [vmem:[%s1452_s2 + $0x10] sm:$0xff]  ;;  %v425_v27 = vld [vmem:[%s1452_s2 + $0x8] sm:$0xff]  ;;  %955 = vmatprep.mubr.msk.f32.mxu0 %vm1069_vm0, %v1068_v15  ;;  %vm82_vm1 = vcmask 130048  }
  0x20   :  { %s660_s11 = sld [smem:[#allocation3 + $0x1]]  ;;  %941 = vmatprep.subr.mxu0 %v1068_v15  ;;  %v424_v28 = vld [vmem:[%s1452_s2] sm:$0xff]  ;;  %v529_v30 = vld [vmem:[#allocation4 + $0x78] sm:$0xff]  ;;  %v528_v31 = vld [vmem:[#allocation4 + $0x70] sm:$0xff]  ;;  %990 = vmatprep.mubr.msk.f32.mxu1 %vm1069_vm0, %v1068_v15  ;;  %vm84_vm2 = vcmask 261120   ;;  %vm86_vm3 = vcmask 392192  }
  0x21   :  { %s1112_s12 = sld [smem:[#allocation3 + $0x83]]  ;;  %942 = vmatpush3.msra.mxu0 %v430_v20  ;;  %959 = vmatpush3.msra.mxu1 %v529_v30  ;;  %v527_v33 = vld [vmem:[#allocation4 + $0x68] sm:$0xff]  ;;  %v526_v34 = vld [vmem:[#allocation4 + $0x60] sm:$0xff]  ;;  %v525_v36 = vld [vmem:[#allocation4 + $0x58] sm:$0xff]  ;;  %vm410_vm4 = vcmask 1040384   ;;  %vm412_vm5 = vcmask 1041408  }
  0x22   :  { %s1114_s13 = sld [smem:[#allocation3 + $0x102]]  ;;  %943 = vmatprep.subr.mxu0 %v1068_v15  ;;  %960 = vmatprep.subr.mxu1 %v1068_v15  ;;  %v524_v38 = vld [vmem:[#allocation4 + $0x50] sm:$0xff]  ;;  %v523_v39 = vld [vmem:[#allocation4 + $0x48] sm:$0xff]  ;;  %v522_v40 = vld [vmem:[#allocation4 + $0x40] sm:$0xff]  ;;  %vm414_vm6 = vcmask 1042432   ;;  %vm416_vm7 = vcmask 1043456  }
  0x23   :  { %p139_p10 = scmp.gt.s32.totalorder %s708_s8, 0  ;;  %p709_p11 = scmp.lt.s32.totalorder %s708_s8, 63  ;;  %944 = vmatpush3.msra.mxu0 %v429_v21  ;;  %961 = vmatpush3.msra.mxu1 %v528_v31  ;;  %v521_v41 = vld [vmem:[#allocation4 + $0x38] sm:$0xff]  ;;  %v520_v42 = vld [vmem:[#allocation4 + $0x30] sm:$0xff]  ;;  %v519_v43 = vld [vmem:[#allocation4 + $0x28] sm:$0xff]  ;;  %vm418_vm8 = vcmask 1044480  }
  0x24   :  { %p96_p12 = scmp.gt.s32.totalorder %s684_s9, 0  ;;  %p685_p13 = scmp.lt.s32.totalorder %s684_s9, 63  ;;  %945 = vmatprep.subr.mxu0 %v1068_v15  ;;  %962 = vmatprep.subr.mxu1 %v1068_v15  ;;  %v518_v44 = vld [vmem:[#allocation4 + $0x20] sm:$0xff]  ;;  %v517_v45 = vld [vmem:[#allocation4 + $0x18] sm:$0xff]  ;;  %vm420_vm9 = vcmask 1045504   ;;  %vm422_vm10 = vcmask 1046528  }
  0x25   :  { %s1458_s8 = smov (!%p139_p10, %s708_s8), 0  ;;  %p103_p0 = scmp.gt.s32.totalorder %s690_s10, 0  ;;  %946 = vmatpush3.msra.mxu0 %v428_v22  ;;  %963 = vmatpush3.msra.mxu1 %v527_v33  ;;  %vm439_vm11 = vcmask 523264  }
  0x26   :  { %s1460_s9 = smov (!%p96_p12, %s684_s9), 0  ;;  %s1462_s8 = smov (!%p709_p11, %s1458_s8), 63  ;;  %947 = vmatprep.subr.mxu0 %v1068_v15  ;;  %964 = vmatprep.subr.mxu1 %v1068_v15 }
  0x27   :  { %s1464_s9 = smov (!%p685_p13, %s1460_s9), 63  ;;  %s143_s15 = scalar_lea.vmem %s1451_s1, %s1462_s8  ;;  %948 = vmatpush3.msra.mxu0 %v427_v23  ;;  %965 = vmatpush3.msra.mxu1 %v526_v34 }
  0x28   :  { %v144_v0 = vld [vmem:[%s143_s15] sm:$0x1]  ;;  %s100_s18 = scalar_lea.vmem %s1451_s1, %s1464_s9  ;;  %p691_p1 = scmp.lt.s32.totalorder %s690_s10, 63  ;;  %949 = vmatprep.subr.mxu0 %v1068_v15  ;;  %966 = vmatprep.subr.mxu1 %v1068_v15 }
  0x29   :  { %160 = vrot.lane.b32.xlu1 %v144_v0, %s1065_s19  ;;  %v101_v1 = vld [vmem:[%s100_s18] sm:$0x1]  ;;  %s1466_s10 = smov (!%p103_p0, %s690_s10), 0  ;;  %p50_p2 = scmp.gt.s32.totalorder %s660_s11, 0  ;;  %950 = vmatpush3.msra.mxu0 %v426_v25 }
  0x2a   :  { %117 = vrot.lane.b32.xlu0 %v101_v1, %s1065_s19  ;;  %p661_p3 = scmp.lt.s32.totalorder %s660_s11, 63  ;;  %s1468_s10 = smov (!%p691_p1, %s1466_s10), 63  ;;  %951 = vmatprep.subr.mxu0 %v1068_v15 }
  0x2b   :  { %s1470_s11 = smov (!%p50_p2, %s660_s11), 0  ;;  %s107_s22 = scalar_lea.vmem %s1451_s1, %s1468_s10  ;;  %952 = vmatpush3.msra.mxu0 %v425_v27  ;;  %967 = vmatpush3.msra.mxu1 %v525_v36 }
  0x2c   :  { %p110_p4 = scmp.gt.s32.totalorder %s1112_s12, 0  ;;  %v108_v2 = vld [vmem:[%s107_s22] sm:$0x1]  ;;  %s1472_s11 = smov (!%p661_p3, %s1470_s11), 63  ;;  %953 = vmatprep.subr.mxu0 %v1068_v15  ;;  %968 = vmatprep.subr.mxu1 %v1068_v15 }
  0x2d   :  { %s54_s27 = scalar_lea.vmem %s1451_s1, %s1472_s11  ;;  %p697_p5 = scmp.lt.s32.totalorder %s1112_s12, 63  ;;  %954 = vmatpush3.msra.mxu0 %v424_v28  ;;  %969 = vmatpush3.msra.mxu1 %v524_v38 }
  0x2e   :  { %121 = vrot.lane.b32.xlu0 %v108_v2, %s1066_s23  ;;  %s111_s24 = scalar_select %p110_p4, %s1112_s12, 0  ;;  %v55_v3 = vld [vmem:[%s54_s27] sm:$0x1]  ;;  %970 = vmatprep.subr.mxu1 %v1068_v15 }
  0x2f   :  { %p146_p6 = scmp.gt.s32.totalorder %s1114_s13, 0  ;;  %p715_p7 = scmp.lt.s32.totalorder %s1114_s13, 63  ;;  %71 = vrot.lane.b32.xlu1 %v55_v3, %s1065_s19  ;;  %971 = vmatpush3.msra.mxu1 %v523_v39 }
  0x30   :  { %s1474_s24 = smov (!%p697_p5, %s111_s24), 63  ;;  %s732_s30 = sld [smem:[#allocation3 + $0x181]]  ;;  %972 = vmatprep.subr.mxu1 %v1068_v15 }
  0x31   :  { %s1476_s13 = smov (!%p146_p6, %s1114_s13), 0  ;;  %s114_s29 = scalar_lea.vmem %s1451_s1, %s1474_s24  ;;  %973 = vmatpush3.msra.mxu1 %v522_v40 }
  0x32   :  { %v115_v4 = vld [vmem:[%s114_s29] sm:$0x1]  ;;  %s1478_s13 = smov (!%p715_p7, %s1476_s13), 63  ;;  %s666_s8 = sld [smem:[#allocation3 + $0x2]]  ;;  %974 = vmatprep.subr.mxu1 %v1068_v15 }
  0x33   :  { %125 = vrot.lane.b32.xlu0 %v115_v4, %s1067_s7  ;;  %s150_s11 = scalar_lea.vmem %s1451_s1, %s1478_s13  ;;  %s720_s12 = sld [smem:[#allocation3 + $0x103]]  ;;  %975 = vmatpush3.msra.mxu1 %v521_v41 }
  0x34   :  { %v151_v5 = vld [vmem:[%s150_s11] sm:$0x1]  ;;  %s738_s14 = sld [smem:[#allocation3 + $0x182]]  ;;  %976 = vmatprep.subr.mxu1 %v1068_v15 }
  0x35   :  { %164 = vrot.lane.b32.xlu1 %v151_v5, %s1066_s23  ;;  %s1146_s4 = sld [smem:[#allocation3 + $0x201]]  ;;  %977 = vmatpush3.msra.mxu1 %v520_v42 }
  0x36   :  { %p182_p8 = scmp.gt.s32.totalorder %s732_s30, 0  ;;  %p733_p9 = scmp.lt.s32.totalorder %s732_s30, 63  ;;  %978 = vmatprep.subr.mxu1 %v1068_v15 }
  0x37   :  { %s1148_s15 = sld [smem:[#allocation3 + $0x3]]  ;;  %979 = vmatpush3.msra.mxu1 %v519_v43 }
  0x38   :  { %s1480_s30 = smov (!%p182_p8, %s732_s30), 0  ;;  %p57_p10 = scmp.gt.s32.totalorder %s666_s8, 0  ;;  %980 = vmatprep.subr.mxu1 %v1068_v15 }
  0x39   :  { %p667_p11 = scmp.lt.s32.totalorder %s666_s8, 63  ;;  %s1482_s30 = smov (!%p733_p9, %s1480_s30), 63  ;;  %981 = vmatpush3.msra.mxu1 %v518_v44 }
  0x3a   :  { %s1484_s8 = smov (!%p57_p10, %s666_s8), 0  ;;  %s186_s13 = scalar_lea.vmem %s1451_s1, %s1482_s30  ;;  %982 = vmatprep.subr.mxu1 %v1068_v15 }
  0x3b   :  { %p153_p12 = scmp.gt.s32.totalorder %s720_s12, 0  ;;  %v187_v6 = vld [vmem:[%s186_s13] sm:$0x1]  ;;  %s1486_s8 = smov (!%p667_p11, %s1484_s8), 63  ;;  %983 = vmatpush3.msra.mxu1 %v517_v45 }
  0x3c   :  { %203 = vrot.lane.b32.xlu0 %v187_v6, %s1065_s19  ;;  %s61_s22 = scalar_lea.vmem %s1451_s1, %s1486_s8  ;;  %p721_p13 = scmp.lt.s32.totalorder %s720_s12, 63  ;;  %984 = vmatprep.subr.mxu1 %v1068_v15 }
  0x3d   :  { %s154_s18 = scalar_select %p153_p12, %s720_s12, 0  ;;  %v62_v7 = vld [vmem:[%s61_s22] sm:$0x1] }
  0x3e   :  { %p189_p0 = scmp.gt.s32.totalorder %s738_s14, 0  ;;  %p739_p1 = scmp.lt.s32.totalorder %s738_s14, 63  ;;  %75 = vrot.lane.b32.xlu1 %v62_v7, %s1066_s23 }
  0x3f   :  { %s1488_s18 = smov (!%p721_p13, %s154_s18), 63  ;;  %p225_p2 = scmp.gt.s32.totalorder %s1146_s4, 0 }
  0x40   :  { %s1490_s14 = smov (!%p189_p0, %s738_s14), 0  ;;  %s157_s26 = scalar_lea.vmem %s1451_s1, %s1488_s18 }
  0x41   :  { %v158_v8 = vld [vmem:[%s157_s26] sm:$0x1]  ;;  %s1492_s14 = smov (!%p739_p1, %s1490_s14), 63  ;;  %p757_p3 = scmp.lt.s32.totalorder %s1146_s4, 63 }
  0x42   :  { %168 = vrot.lane.b32.xlu0 %v158_v8, %s1067_s7  ;;  %s226_s27 = scalar_select %p225_p2, %s1146_s4, 0 }
  0x43   :  { %s193_s29 = scalar_lea.vmem %s1451_s1, %s1492_s14  ;;  %p64_p4 = scmp.gt.s32.totalorder %s1148_s15, 0 }
  0x44   :  { %v194_v9 = vld [vmem:[%s193_s29] sm:$0x1]  ;;  %p673_p5 = scmp.lt.s32.totalorder %s1148_s15, 63  ;;  %s1494_s27 = smov (!%p757_p3, %s226_s27), 63 }
  0x45   :  { %207 = vrot.lane.b32.xlu1 %v194_v9, %s1066_s23  ;;  %s1496_s15 = smov (!%p64_p4, %s1148_s15), 0  ;;  %s229_s9 = scalar_lea.vmem %s1451_s1, %s1494_s27 }
  0x46   :  { %s744_s10 = sld [smem:[#allocation3 + $0x183]]  ;;  %v230_v10 = vld [vmem:[%s229_s9] sm:$0x1]  ;;  %s1498_s15 = smov (!%p673_p5, %s1496_s15), 63 }
  0x47   :  { %246 = vrot.lane.b32.xlu0 %v230_v10, %s1065_s19  ;;  %s762_s11 = sld [smem:[#allocation3 + $0x202]]  ;;  %s68_s4 = scalar_lea.vmem %s1451_s1, %s1498_s15 }
  0x48   :  { %s780_s16 = sld [smem:[#allocation3 + $0x281]]  ;;  %v69_v11 = vld [vmem:[%s68_s4] sm:$0x1] }
  0x49   :  { %s1179_s17 = sld [smem:[#allocation3 + $0x203]]  ;;  %79 = vrot.lane.b32.xlu1 %v69_v11, %s1067_s7 }
  0x4a   :  { %s1182_s13 = sld [smem:[#allocation3 + $0x282]] }
  0x4b   :  { %s1184_s18 = sld [smem:[#allocation3 + $0x301]] }
  0x4c   :  { %p196_p6 = scmp.gt.s32.totalorder %s744_s10, 0  ;;  %p745_p7 = scmp.lt.s32.totalorder %s744_s10, 63 }
  0x4d   :  { %p232_p8 = scmp.gt.s32.totalorder %s762_s11, 0  ;;  %p763_p9 = scmp.lt.s32.totalorder %s762_s11, 63 }
  0x4e   :  { %s1500_s10 = smov (!%p196_p6, %s744_s10), 0  ;;  %p268_p10 = scmp.gt.s32.totalorder %s780_s16, 0 }
  0x4f   :  { %s1502_s10 = smov (!%p745_p7, %s1500_s10), 63  ;;  %s1504_s11 = smov (!%p232_p8, %s762_s11), 0 }
  0x50   :  { %s200_s21 = scalar_lea.vmem %s1451_s1, %s1502_s10  ;;  %s1506_s11 = smov (!%p763_p9, %s1504_s11), 63 }
  0x51   :  { %v201_v12 = vld [vmem:[%s200_s21] sm:$0x1]  ;;  %s269_s22 = scalar_select %p268_p10, %s780_s16, 0 }
  0x52   :  { %211 = vrot.lane.b32.xlu0 %v201_v12, %s1067_s7  ;;  %s236_s26 = scalar_lea.vmem %s1451_s1, %s1506_s11  ;;  %p781_p11 = scmp.lt.s32.totalorder %s780_s16, 63 }
  0x53   :  { %v237_v13 = vld [vmem:[%s236_s26] sm:$0x1]  ;;  %p239_p12 = scmp.gt.s32.totalorder %s1179_s17, 0  ;;  %p769_p13 = scmp.lt.s32.totalorder %s1179_s17, 63 }
  0x54   :  { %250 = vrot.lane.b32.xlu1 %v237_v13, %s1066_s23  ;;  %s1508_s22 = smov (!%p781_p11, %s269_s22), 63  ;;  %p275_p0 = scmp.gt.s32.totalorder %s1182_s13, 0 }
  0x55   :  { %s1510_s17 = smov (!%p239_p12, %s1179_s17), 0  ;;  %s272_s30 = scalar_lea.vmem %s1451_s1, %s1508_s22 }
  0x56   :  { %v273_v16 = vld [vmem:[%s272_s30] sm:$0x1]  ;;  %s1512_s17 = smov (!%p769_p13, %s1510_s17), 63  ;;  %p787_p1 = scmp.lt.s32.totalorder %s1182_s13, 63 }
  0x57   :  { %289 = vrot.lane.b32.xlu0 %v273_v16, %s1065_s19  ;;  %s276_s8 = scalar_select %p275_p0, %s1182_s13, 0 }
  0x58   :  { %s243_s11 = scalar_lea.vmem %s1451_s1, %s1512_s17  ;;  %p311_p2 = scmp.gt.s32.totalorder %s1184_s18, 0 }
  0x59   :  { %v244_v17 = vld [vmem:[%s243_s11] sm:$0x1]  ;;  %p805_p3 = scmp.lt.s32.totalorder %s1184_s18, 63  ;;  %s1514_s8 = smov (!%p787_p1, %s276_s8), 63 }
  0x5a   :  { %254 = vrot.lane.b32.xlu1 %v244_v17, %s1067_s7  ;;  %s1516_s18 = smov (!%p311_p2, %s1184_s18), 0  ;;  %s279_s4 = scalar_lea.vmem %s1451_s1, %s1514_s8 }
  0x5b   :  { %s792_s16 = sld [smem:[#allocation3 + $0x283]]  ;;  %v280_v18 = vld [vmem:[%s279_s4] sm:$0x1]  ;;  %s1518_s18 = smov (!%p805_p3, %s1516_s18), 63 }
  0x5c   :  { %293 = vrot.lane.b32.xlu0 %v280_v18, %s1066_s23  ;;  %s810_s15 = sld [smem:[#allocation3 + $0x302]]  ;;  %s315_s13 = scalar_lea.vmem %s1451_s1, %s1518_s18 }
  0x5d   :  { %s1224_s21 = sld [smem:[#allocation3 + $0x381]]  ;;  %v316_v19 = vld [vmem:[%s315_s13] sm:$0x1] }
  0x5e   :  { %s1226_s22 = sld [smem:[#allocation3 + $0x303]]  ;;  %332 = vrot.lane.b32.xlu1 %v316_v19, %s1065_s19 }
  0x5f   :  { %s1235_s28 = sld [smem:[#allocation3 + $0x382]] }
  0x60   :  { %s1238_s18 = sld [smem:[#allocation3 + $0x383]] }
  0x61   :  { %p282_p4 = scmp.gt.s32.totalorder %s792_s16, 0  ;;  %p793_p5 = scmp.lt.s32.totalorder %s792_s16, 63 }
  0x62   :  { %p318_p6 = scmp.gt.s32.totalorder %s810_s15, 0  ;;  %p811_p7 = scmp.lt.s32.totalorder %s810_s15, 63 }
  0x63   :  { %s1520_s16 = smov (!%p282_p4, %s792_s16), 0  ;;  %p354_p8 = scmp.gt.s32.totalorder %s1224_s21, 0 }
  0x64   :  { %s1522_s16 = smov (!%p793_p5, %s1520_s16), 63  ;;  %s1524_s15 = smov (!%p318_p6, %s810_s15), 0 }
  0x65   :  { %s286_s30 = scalar_lea.vmem %s1451_s1, %s1522_s16  ;;  %s1526_s15 = smov (!%p811_p7, %s1524_s15), 63 }
  0x66   :  { %v287_v24 = vld [vmem:[%s286_s30] sm:$0x1]  ;;  %s355_s12 = scalar_select %p354_p8, %s1224_s21, 0 }
  0x67   :  { %297 = vrot.lane.b32.xlu0 %v287_v24, %s1067_s7  ;;  %s322_s16 = scalar_lea.vmem %s1451_s1, %s1526_s15  ;;  %p829_p9 = scmp.lt.s32.totalorder %s1224_s21, 63 }
  0x68   :  { %v323_v26 = vld [vmem:[%s322_s16] sm:$0x1]  ;;  %p325_p10 = scmp.gt.s32.totalorder %s1226_s22, 0  ;;  %p817_p11 = scmp.lt.s32.totalorder %s1226_s22, 63 }
  0x69   :  { %336 = vrot.lane.b32.xlu1 %v323_v26, %s1066_s23  ;;  %s1528_s12 = smov (!%p829_p9, %s355_s12), 63  ;;  %p361_p12 = scmp.gt.s32.totalorder %s1235_s28, 0 }
  0x6a   :  { %s1530_s22 = smov (!%p325_p10, %s1226_s22), 0  ;;  %s358_s25 = scalar_lea.vmem %s1451_s1, %s1528_s12 }
  0x6b   :  { %v359_v29 = vld [vmem:[%s358_s25] sm:$0x1]  ;;  %s1532_s22 = smov (!%p817_p11, %s1530_s22), 63  ;;  %p835_p13 = scmp.lt.s32.totalorder %s1235_s28, 63 }
  0x6c   :  { %375 = vrot.lane.b32.xlu0 %v359_v29, %s1065_s19  ;;  %s362_s0 = scalar_select %p361_p12, %s1235_s28, 0 }
  0x6d   :  { %s329_s8 = scalar_lea.vmem %s1451_s1, %s1532_s22  ;;  %p368_p0 = scmp.gt.s32.totalorder %s1238_s18, 0 }
  0x6e   :  { %v330_v32 = vld [vmem:[%s329_s8] sm:$0x1]  ;;  %p841_p1 = scmp.lt.s32.totalorder %s1238_s18, 63  ;;  %s1534_s0 = smov (!%p835_p13, %s362_s0), 63 }
  0x6f   :  { %340 = vrot.lane.b32.xlu1 %v330_v32, %s1067_s7  ;;  %s1536_s18 = smov (!%p368_p0, %s1238_s18), 0  ;;  %s365_s22 = scalar_lea.vmem %s1451_s1, %s1534_s0 }
  0x70   :  { %v366_v35 = vld [vmem:[%s365_s22] sm:$0x1]  ;;  %s1538_s18 = smov (!%p841_p1, %s1536_s18), 63  ;;  %s1329_s11 = sld [smem:[#allocation3 + $0x180]] }
  0x71   :  { %379 = vrot.lane.b32.xlu0 %v366_v35, %s1066_s23  ;;  %s372_s10 = scalar_lea.vmem %s1451_s1, %s1538_s18  ;;  %s702_s23 = sld [smem:[#allocation3 + $0x100]] }
  0x72   :  { %v373_v37 = vld [vmem:[%s372_s10] sm:$0x1]  ;;  %s42_s18 = sld [smem:[#allocation3]]  ;;  %s1070_s21 = smov [#allocation7]  }
  0x73   :  { %383 = vrot.lane.b32.xlu1 %v373_v37, %s1067_s7  ;;  %s678_s7 = sld [smem:[#allocation3 + $0x80]] }
  0x74   :  { %s1333_s12 = sld [smem:[#allocation3 + $0x200]] }
  0x75   :  { %s774_s4 = sld [smem:[#allocation3 + $0x280]] }
  0x76   :  { %p175_p8 = scmp.gt.s32.totalorder %s1329_s11, 0  ;;  %s1347_s16 = sld [smem:[#allocation3 + $0x300]] }
  0x77   :  { %p132_p2 = scmp.gt.s32.totalorder %s702_s23, 0  ;;  %p703_p3 = scmp.lt.s32.totalorder %s702_s23, 63 }
  0x78   :  { %p43_p5 = scmp.gt.s32.totalorder %s42_s18, 0  ;;  %p655_p7 = scmp.lt.s32.totalorder %s42_s18, 63 }
  0x79   :  { %s1540_s23 = smov (!%p132_p2, %s702_s23), 0  ;;  %p89_p4 = scmp.gt.s32.totalorder %s678_s7, 0 }
  0x7a   :  { %p679_p6 = scmp.lt.s32.totalorder %s678_s7, 63  ;;  %s1542_s23 = smov (!%p703_p3, %s1540_s23), 63 }
  0x7b   :  { %s1544_s7 = smov (!%p89_p4, %s678_s7), 0  ;;  %p218_p9 = scmp.gt.s32.totalorder %s1333_s12, 0 }
  0x7c   :  { %s44_s14 = scalar_select %p43_p5, %s42_s18, 0 }
  0x7d   :  { %s1546_s7 = smov (!%p679_p6, %s1544_s7), 63  ;;  %p727_p10 = scmp.lt.s32.totalorder %s1329_s11, 63 }
  0x7e   :  { %s1548_s14 = smov (!%p655_p7, %s44_s14), 63  ;;  %s1353_s17 = sld [smem:[#allocation3 + $0x380]] }
  0x7f   :  { %s176_s20 = scalar_select %p175_p8, %s1329_s11, 0 }
  0x80   :  { %s219_s15 = scalar_select %p218_p9, %s1333_s12, 0 }
  0x81   :  { %p261_p11 = scmp.gt.s32.totalorder %s774_s4, 0  ;;  %s93_s24 = scalar_lea.vmem %s1451_s1, %s1546_s7 }
  0x82   :  { %p751_p12 = scmp.lt.s32.totalorder %s1333_s12, 63  ;;  %s1550_s20 = smov (!%p727_p10, %s176_s20), 63  ;;  %v94_v0 = vld [vmem:[%s93_s24] sm:$0x1] }
  0x83   :  { %p775_p13 = scmp.lt.s32.totalorder %s774_s4, 63  ;;  %p304_p0 = scmp.gt.s32.totalorder %s1347_s16, 0 }
  0x84   :  { %s1552_s4 = smov (!%p261_p11, %s774_s4), 0  ;;  %s1554_s15 = smov (!%p751_p12, %s219_s15), 63 }
  0x85   :  { %p799_p1 = scmp.lt.s32.totalorder %s1347_s16, 63  ;;  %p347_p2 = scmp.gt.s32.totalorder %s1353_s17, 0 }
  0x86   :  { %s1556_s16 = smov (!%p304_p0, %s1347_s16), 0  ;;  %s1558_s4 = smov (!%p775_p13, %s1552_s4), 63 }
  0x87   :  { %s136_s27 = scalar_lea.vmem %s1451_s1, %s1542_s23  ;;  %p823_p3 = scmp.lt.s32.totalorder %s1353_s17, 63 }
  0x88   :  { %s348_s0 = scalar_select %p347_p2, %s1353_s17, 0  ;;  %v137_v5 = vld [vmem:[%s136_s27] sm:$0x1] }
  0x89   :  { %s1560_s16 = smov (!%p799_p1, %s1556_s16), 63  ;;  %s47_s8 = scalar_lea.vmem %s1451_s1, %s1548_s14 }
  0x8a   :  { %s179_s22 = scalar_lea.vmem %s1451_s1, %s1550_s20  ;;  %s222_s10 = scalar_lea.vmem %s1451_s1, %s1554_s15  ;;  %v48_v6 = vld [vmem:[%s47_s8] sm:$0x1] }
  0x8b   :  { %s265_s18 = scalar_lea.vmem %s1451_s1, %s1558_s4  ;;  %s1562_s0 = smov (!%p823_p3, %s348_s0), 63  ;;  %v180_v8 = vld [vmem:[%s179_s22] sm:$0x1] }
  0x8c   :  { %s308_s14 = scalar_lea.vmem %s1451_s1, %s1560_s16  ;;  %v223_v9 = vld [vmem:[%s222_s10] sm:$0x1]  ;;  %s351_s17 = scalar_lea.vmem %s1451_s1, %s1562_s0 }
  0x8d   :  { %v266_v10 = vld [vmem:[%s265_s18] sm:$0x1]  ;;  %s614_s24 = sshll.u32 %s1070_s21, 4  ;;  %s615_s24 = int_to_ptr.vmem [resolvable:$true] %s614_s24 }
  0x8e   :  { %v309_v16 = vld [vmem:[%s308_s14] sm:$0x1]  ;;  %s1035_s25 = scalar_lea.vmem %s615_s24, 128  ;;  %p1040_p5 = scmp.lt.s32.totalorder %s615_s24, %s615_s24 }
  0x8f   :  { %v352_v31 = vld [vmem:[%s351_s17] sm:$0x1]  ;;  %p1036_p4 = scmp.ne.s32.totalorder %s615_s24, %s1035_s25  ;;  %p1041_p6 = scmp.lt.s32.totalorder %s1035_s25, %s1035_s25 }
  0x91   :  { %p1042_p7 = por %p1041_p6, %p1040_p5 }
  0x93   :  { %p1043_p8 = pnand %p1042_p7, %p1036_p4 }
  0x9b   :  { %v1313_v47 = vpop.permute.xlu1 %160 }
  0x9c   :  { %v1311_v46 = vpop.permute.xlu0 %117  ;;  %v171_v11 = vsel %vm82_vm1, %v137_v5, %v1313_v47 }
  0x9d   :  { %v128_v2 = vsel %vm82_vm1, %v94_v0, %v1311_v46 }
  0xa0   :  { %v1315_v48 = vpop.permute.xlu0 %121 }
  0xa1   :  { %v1317_v49 = vpop.permute.xlu1 %71  ;;  %v129_v3 = vsel %vm84_vm2, %v128_v2, %v1315_v48 }
  0xa2   :  { %v83_v12 = vsel %vm82_vm1, %v48_v6, %v1317_v49 }
  0xa5   :  { %v1319_v50 = vpop.permute.xlu0 %125 }
  0xa6   :  { %v130_v7 = vsel %vm86_vm3, %v129_v3, %v1319_v50 }
  0xa7   :  { %v1321_v51 = vpop.permute.xlu1 %164  ;;  %v390_v13 = vrot.slane %v130_v7, 7 }
  0xa8   :  { %v172_v18 = vsel %vm84_vm2, %v171_v11, %v1321_v51 }
  0xae   :  { %v1323_v52 = vpop.permute.xlu0 %203 }
  0xaf   :  { %v214_v14 = vsel %vm82_vm1, %v180_v8, %v1323_v52 }
  0xb0   :  { %v1325_v53 = vpop.permute.xlu1 %75 }
  0xb1   :  { %v85_v19 = vsel %vm84_vm2, %v83_v12, %v1325_v53  ;;  %v516_v53 = vld [vmem:[#allocation4 + $0x10] sm:$0xff] }
  0xb2   :  { %985 = vmatpush3.msra.mxu1 %v516_v53 }
  0xb3   :  { %986 = vmatprep.subr.mxu1 %v1068_v15 }
  0xb4   :  { %v1327_v54 = vpop.permute.xlu0 %168 }
  0xb5   :  { %v173_v27 = vsel %vm86_vm3, %v172_v18, %v1327_v54  ;;  %v515_v54 = vld [vmem:[#allocation4 + $0x8] sm:$0xff] }
  0xb6   :  { %v393_v37 = vrot.slane %v173_v27, 6  ;;  %987 = vmatpush3.msra.mxu1 %v515_v54 }
  0xb7   :  { %v1331_v55 = vpop.permute.xlu1 %207  ;;  %988 = vmatprep.subr.mxu1 %v1068_v15 }
  0xb8   :  { %v215_v20 = vsel %vm84_vm2, %v214_v14, %v1331_v55  ;;  %v514_v55 = vld [vmem:[#allocation4] sm:$0xff] }
  0xb9   :  { %v1335_v56 = vpop.permute.xlu0 %246  ;;  %989 = vmatpush3.msra.mxu1 %v514_v55 }
  0xba   :  { %v257_v21 = vsel %vm82_vm1, %v223_v9, %v1335_v56  ;;  %v846_v56 = vld [vmem:[%s1453_s3] ss:$0 sm:$0xff] }
  0xbb   :  { %v1339_v57 = vpop.permute.xlu1 %79 }
  0xbc   :  { %v87_v22 = vsel %vm86_vm3, %v85_v19, %v1339_v57 }
  0xbd   :  { %v411_v34 = vsel %vm410_vm4, %v87_v22, %v390_v13 }
  0xbe   :  { %v413_v43 = vsel %vm412_vm5, %v411_v34, %v393_v37 }
  0xc4   :  { %v1344_v58 = vpop.permute.xlu0 %211 }
  0xc5   :  { %v216_v23 = vsel %vm86_vm3, %v215_v20, %v1344_v58 }
  0xc6   :  { %v251_v59 = vpop.permute.xlu1 %250  ;;  %v396_v35 = vrot.slane %v216_v23, 5 }
  0xc7   :  { %v258_v24 = vsel %vm84_vm2, %v257_v21, %v251_v59 }
  0xc8   :  { %v415_v45 = vsel %vm414_vm6, %v413_v43, %v396_v35 }
  0xc9   :  { %v290_v60 = vpop.permute.xlu0 %289 }
  0xca   :  { %v300_v25 = vsel %vm82_vm1, %v266_v10, %v290_v60 }
  0xcc   :  { %v255_v61 = vpop.permute.xlu1 %254 }
  0xcd   :  { %v259_v28 = vsel %vm86_vm3, %v258_v24, %v255_v61  ;;  %v848_v61 = vld [vmem:[%s1455_s5] ss:$0 sm:$0xff] }
  0xce   :  { %v294_v62 = vpop.permute.xlu0 %293  ;;  %v399_v38 = vrot.slane %v259_v28, 4 }
  0xcf   :  { %v301_v29 = vsel %vm84_vm2, %v300_v25, %v294_v62 }
  0xd0   :  { %v333_v63 = vpop.permute.xlu1 %332  ;;  %v417_v47 = vsel %vm416_vm7, %v415_v45, %v399_v38 }
  0xd1   :  { %v343_v30 = vsel %vm82_vm1, %v309_v16, %v333_v63 }
  0xd9   :  { %v298_v1 = vpop.permute.xlu0 %297 }
  0xda   :  { %v302_v32 = vsel %vm86_vm3, %v301_v29, %v298_v1 }
  0xdb   :  { %v337_v4 = vpop.permute.xlu1 %336  ;;  %v402_v41 = vrot.slane %v302_v32, 3 }
  0xdc   :  { %v344_v33 = vsel %vm84_vm2, %v343_v30, %v337_v4 }
  0xdd   :  { %v419_v49 = vsel %vm418_vm8, %v417_v47, %v402_v41 }
  0xde   :  { %v376_v17 = vpop.permute.xlu0 %375 }
  0xdf   :  { %v386_v39 = vsel %vm82_vm1, %v352_v31, %v376_v17 }
  0xe1   :  { %v341_v26 = vpop.permute.xlu1 %340 }
  0xe2   :  { %v345_v36 = vsel %vm86_vm3, %v344_v33, %v341_v26 }
  0xe3   :  { %v380_v40 = vpop.permute.xlu0 %379  ;;  %v405_v44 = vrot.slane %v345_v36, 2 }
  0xe4   :  { %v387_v42 = vsel %vm84_vm2, %v386_v39, %v380_v40 }
  0xe5   :  { %v384_v46 = vpop.permute.xlu1 %383  ;;  %v421_v51 = vsel %vm420_vm9, %v419_v49, %v405_v44 }
  0xe6   :  { %v388_v48 = vsel %vm86_vm3, %v387_v42, %v384_v46 }
  0xe7   :  { %v408_v50 = vrot.slane %v388_v48, 1 }
  0xe9   :  { %v423_v52 = vsel %vm422_vm10, %v421_v51, %v408_v50 }
  0xea   :  { %956 = vmatmul.mubr.msk.f32.vlgmr.msra.gmra.mxu0 %vm439_vm11, %v423_v52 }
 0x1aa   :  { %v509_v57 = vpop.f32.mrf.mxu0 }
 0x1ab   :  { %v510_v58 = vadd.f32 %v846_v56, %v509_v57 }
 0x1ac   :  { %v957_v59 = vpop.f32.mrf.mxu0 }
 0x1ad   :  { %v513_v60 = vmax.f32 %v510_v58, 0.0 }
 0x1af   :  { %991 = vmatmul.mubr.f32.vlgmr.msra.gmra.mxu1 %v513_v60 }
 0x26f   :  { %v603_v62 = vpop.f32.mrf.mxu1 }
 0x270   :  { %v604_v63 = vadd.f32 %v848_v61, %v603_v62 }
 0x271   :  { %v992_v15 = vpop.f32.mrf.mxu1 }
 0x272   :  { %607 = vst [vmem:[#allocation7] sm:$0xff] %v604_v63 }
 0x273   :  { %1046 = shalt.err (!%p1043_p8)
}
 0x274   :  { %617 = dma.vmem_to_hbm [thread:$0]  %s615_s24, 128, %s1456_s6, [#allocation6]  }
 0x275   :  { %1059 = dma.done.wait [#allocation6], 128  }
 0x276   :  { %1060 = vsyncadd [#allocation6], 4294967168 }
 0x277   :  { %621 = vsyncpa [#allocation5], 1 }
 0x278   :  { %622 = vsyncpa [#allocation6], 1 }

</bundles_post_ra>
